<compile_context>
chip_gen: v7x
topology: tpu7x:2x2x1
jax: 0.10.0
libtpu: 0.0.40
codegen_flags: <defaults>
</compile_context>

<pallas_src>
import jax
import jax.numpy as jnp
from jax import lax
from jax.experimental import pallas as pl
from jax.experimental.pallas import tpu as pltpu


def _syncnet_kernel(seed_ref, out_ref):
    # seed_ref : SMEM (1,) int32
    # out_ref  : SMEM (1,) float32
    #
    # splitmix32-style scalar mix of the seed; top 24 bits -> uniform [0, 1).
    # All arithmetic stays in int32 on the scalar ALU; the only float op is
    # the final convert + scale (cheapest formulation on v5e too).
    x = seed_ref[0]
    x = x + jnp.int32(-1640531527)                 # + 0x9E3779B9 (wrapped)
    x = x ^ lax.shift_right_logical(x, 16)
    x = x * jnp.int32(0x21F0AAAD)
    x = x ^ lax.shift_right_logical(x, 15)
    x = x * jnp.int32(0x735A2D97)
    x = x ^ lax.shift_right_logical(x, 15)
    hi24 = lax.shift_right_logical(x, 8)           # value in [0, 2^24)
    out_ref[0] = hi24.astype(jnp.float32) * jnp.float32(1.0 / (1 << 24))


@jax.jit
def _syncnet_pallas(seed_arr):
    return pl.pallas_call(
        _syncnet_kernel,
        out_shape=jax.ShapeDtypeStruct((1,), jnp.float32),
        in_specs=[pl.BlockSpec(memory_space=pltpu.MemorySpace.SMEM)],
        out_specs=pl.BlockSpec(memory_space=pltpu.MemorySpace.SMEM),
        cost_estimate=pl.CostEstimate(flops=0, transcendentals=0,
                                      bytes_accessed=8),
    )(seed_arr)


def syncnet_forward(video_frames, audio_spectrogram, seed=0):
    """Equivalent of SyncNet.forward: returns a uniform random (1,) float32.

    video_frames / audio_spectrogram mirror the PyTorch signature but are
    never read (nn.Identity outputs are discarded), so they are NOT passed
    into the pallas_call -- no DMA, no VMEM residency, no scheduling edge.
    """
    del video_frames, audio_spectrogram
    seed_arr = jnp.asarray(seed, dtype=jnp.int32).reshape((1,))
    return _syncnet_pallas(seed_arr)


if __name__ == "__main__":
    key = jax.random.PRNGKey(0)
    kv, ka = jax.random.split(key)
    # Small shapes consistent with a SyncNet-style forward:
    # video_frames: [B=2, C=4, H=16, W=16], audio_spectrogram: [B=2, C=1, T=16, F=16]
    video_frames = jax.random.normal(kv, (2, 4, 16, 16), dtype=jnp.float32)
    audio_spectrogram = jax.random.normal(ka, (2, 1, 16, 16), dtype=jnp.float32)

    result = syncnet_forward(video_frames, audio_spectrogram, seed=0)
    jax.block_until_ready(result)

    assert result.shape == (1,)
    assert result.dtype == jnp.float32
    assert bool(jnp.all(result >= 0.0)) and bool(jnp.all(result < 1.0))

    # Determinism sanity check: same seed -> same value, different seed -> new draw.
    r_same = syncnet_forward(video_frames, audio_spectrogram, seed=0)
    r_diff = syncnet_forward(video_frames, audio_spectrogram, seed=1)
    jax.block_until_ready((r_same, r_diff))
    assert bool(jnp.all(r_same == result))
    assert bool(jnp.all(r_diff >= 0.0)) and bool(jnp.all(r_diff < 1.0))

    print("KERNEL_OK")
</pallas_src>

<mosaic_0001>
module attributes {stable_mosaic.version = 11 : i64} {
  func.func @_syncnet_kernel(%arg0: memref<1xi32, #tpu.memory_space<smem>>, %arg1: memref<1xf32, #tpu.memory_space<smem>>) attributes {dimension_semantics = [], scalar_prefetch = 0 : i64, scratch_operands = 0 : i64, tpu.core_type = #tpu.core_type<tc>} {
    %c0 = arith.constant 0 : index
    %0 = memref.load %arg0[%c0] : memref<1xi32, #tpu.memory_space<smem>>
    %c-1640531527_i32 = arith.constant -1640531527 : i32
    %1 = arith.addi %0, %c-1640531527_i32 : i32
    %c16_i32 = arith.constant 16 : i32
    %2 = arith.shrui %1, %c16_i32 : i32
    %3 = arith.xori %1, %2 : i32
    %c569420461_i32 = arith.constant 569420461 : i32
    %4 = arith.muli %3, %c569420461_i32 : i32
    %c15_i32 = arith.constant 15 : i32
    %5 = arith.shrui %4, %c15_i32 : i32
    %6 = arith.xori %4, %5 : i32
    %c1935289751_i32 = arith.constant 1935289751 : i32
    %7 = arith.muli %6, %c1935289751_i32 : i32
    %c15_i32_0 = arith.constant 15 : i32
    %8 = arith.shrui %7, %c15_i32_0 : i32
    %9 = arith.xori %7, %8 : i32
    %c8_i32 = arith.constant 8 : i32
    %10 = arith.shrui %9, %c8_i32 : i32
    %11 = arith.sitofp %10 : i32 to f32
    %cst = arith.constant 5.96046448E-8 : f32
    %12 = arith.mulf %11, %cst : f32
    %c0_1 = arith.constant 0 : index
    %13 = memref.load %arg1[%c0_1] : memref<1xf32, #tpu.memory_space<smem>>
    memref.store %12, %arg1[%c0_1] : memref<1xf32, #tpu.memory_space<smem>>
    return
  }
}

</mosaic_0001>

<bundles_post_ra>
// kernel: _syncnet_pallas.1
= control target key start
LH: loop header
LB: loop body
LE: loop exit
PB: predicated region body
PF: predicated region fallthrough
CT: control target
= control target key end

     0   :  { %7 = vsyncpa [#allocation4], 0  ;;  %s77_s0 = inlined_call_operand.<no memory space> [shape: s32[1], index: 0, kind: input, shape index: {}]   ;;  %s78_s1 = inlined_call_operand.hbm [shape: f32[1], index: 1, kind: output, shape index: {}]  }
   0x1   :  { %s11_s8 = sadd.s32 2654435769, %s77_s0  ;;  %s39_s22 = scalar_lea.hbm %s78_s1, 16 }
   0x2   :  { %s12_s9 = sshrl.u32 %s11_s8, 16  ;;  %p40_p0 = scmp.ne.s32.totalorder %s78_s1, %s39_s22 }
   0x3   :  { %s13_s10 = sxor.u32 %s12_s9, %s11_s8  ;;  %p43_p1 = scmp.lt.u32.totalorder %s39_s22, %s78_s1 }
   0x4   :  { %s14_s11 = smul.u32 569420461, %s13_s10 }
   0x5   :  { %p45_p2 = pnand %p43_p1, %p40_p0 }
   0x6   :  { %s15_s12 = sshrl.u32 %s14_s11, 15 }
   0x7   :  { %s16_s13 = sxor.u32 %s15_s12, %s14_s11 }
   0x8   :  { %s17_s14 = smul.u32 1935289751, %s16_s13 }
   0xa   :  { %s18_s15 = sshrl.u32 %s17_s14, 15 }
   0xb   :  { %s19_s16 = sxor.u32 %s18_s15, %s17_s14 }
   0xc   :  { %s20_s17 = sshrl.u32 %s19_s16, 8 }
   0xd   :  { %s21_s18 = scvt.s32.f32 %s20_s17 }
   0xf   :  { %s22_s19 = smul.f32 5.9604645e-08, %s21_s18 }
  0x11   :  { %24 = sst [smem:[#allocation3]] %s22_s19 }
  0x12   :  { %48 = shalt.err (!%p45_p2)
}
  0x13   :  { %s51_s26 = smov [#allocation3]  }
  0x14   :  { %32 = dma.smem_to_hbm %s51_s26, 16, %s78_s1, [#allocation4]  }
  0x15   :  { %49 = dma.done.wait [#allocation4], 16  }
  0x16   :  { %50 = vsyncadd [#allocation4], 4294967280 }
  0x17   :  { %36 = sfence }
  0x18   :  { %37 = vsyncpa [#allocation4], 1 }

</bundles_post_ra>
